<compile_context>
chip_gen: v7x
topology: tpu7x:2x2x1
jax: 0.10.0
libtpu: 0.0.40
codegen_flags: <defaults>
</compile_context>

<pallas_src>
import math
import jax
import jax.numpy as jnp
from jax.experimental import pallas as pl
from jax.experimental.pallas import tpu as pltpu

_LANE = 128     # last (lane) dim padded to a multiple of this
_SUBLANE = 8    # second-to-last (sublane) dim padded to a multiple of this


def _round_up(n, m):
    return ((n + m - 1) // m) * m


def _pad2d(a, rows, cols):
    r, c = a.shape
    if r == rows and c == cols:
        return a
    return jnp.pad(a, ((0, rows - r), (0, cols - c)))


# ---------------------------------------------------------------------------
# Kernel body (shared by the gridless and M-tiled paths).
# refs = (x_ref, w1_ref, b1_ref, w2_ref, b2_ref, ..., o_ref)
# ---------------------------------------------------------------------------
def _fused_mlp_kernel(*refs):
    x_ref, o_ref = refs[0], refs[-1]
    n_layers = (len(refs) - 2) // 2
    h = x_ref[...]
    for l in range(n_layers):
        w = refs[1 + 2 * l][...]
        b = refs[2 + 2 * l][...]
        # MXU matmul, f32 accumulation, precision pinned so f32 operands are
        # not silently decomposed into bf16 passes (keeps the 1e-5 guarantee).
        h = jnp.dot(h, w,
                    preferred_element_type=jnp.float32,
                    precision=jax.lax.Precision.HIGHEST) + b
    # TODO(synk): if layers get wide enough that h exceeds ~64 vregs, stage h
    # in a VMEM scratch buffer instead of carrying a large SSA value.
    o_ref[...] = h.astype(o_ref.dtype)


# ---------------------------------------------------------------------------
# One-time parameter preparation (padding hoisted out of the forward path).
# ---------------------------------------------------------------------------
def init_linear_params(key, layer_dim, dtype=jnp.float32):
    """Deterministic init mimicking PyTorch nn.Linear default (U(-k,k), k=1/sqrt(fan_in))."""
    params = []
    for idim, odim in zip(layer_dim[:-1], layer_dim[1:]):
        key, kw, kb = jax.random.split(key, 3)
        bound = 1.0 / math.sqrt(idim)
        # stored already transposed: (in, out)
        w_t = jax.random.uniform(kw, (idim, odim), dtype=dtype, minval=-bound, maxval=bound)
        b = jax.random.uniform(kb, (1, odim), dtype=dtype, minval=-bound, maxval=bound)
        params.append((w_t, b))
    return params


def prepare_params(params):
    """Zero-pad weights/biases to lane-dense shapes ONCE (call at init time).

    Zero padding is mathematically inert: padded input columns hit zero weight
    rows, padded bias columns are zero, so results in the logical slice are exact.
    """
    dims = [params[0][0].shape[0]] + [w.shape[1] for w, _ in params]
    dims_p = [_round_up(d, _LANE) for d in dims]
    padded = []
    for l, (w_t, b) in enumerate(params):
        padded.append((_pad2d(w_t, dims_p[l], dims_p[l + 1]),
                       _pad2d(b, 1, dims_p[l + 1])))
    return padded, dims, dims_p


# ---------------------------------------------------------------------------
# Forward
# ---------------------------------------------------------------------------
def fused_linear_mlp(x, padded_params, dims, dims_p, *, tm=256):
    """Fused MLP forward (one pallas_call); intermediates never leave VMEM.

    x: (B, I) unpadded. padded_params: list of (w_t, b) already lane-padded.
    """
    B, _ = x.shape
    out_dim = dims[-1]
    Ip, Op = dims_p[0], dims_p[-1]
    itemsize = jnp.dtype(x.dtype).itemsize

    flat_params = []
    for w, b in padded_params:
        flat_params += [w, b]
    weight_bytes = sum(a.size * a.dtype.itemsize for a in flat_params)
    max_width = max(dims_p)

    if B <= tm:
        # -------- small-batch path: no grid, no pipeline, single buffers -----
        Bp = _round_up(B, _SUBLANE)
        xp = _pad2d(x, Bp, Ip)
        flat_args = [xp] + flat_params

        needed = (sum(a.size * a.dtype.itemsize for a in flat_args)   # inputs (1 buffer each)
                  + Bp * Op * itemsize                                 # output buffer
                  + Bp * max_width * 4)                                # live activation
        vmem_limit = int(min(max(2 * needed, 32 << 20), 64 << 20))     # <= v7x physical VMEM
        assert needed <= vmem_limit, "fused whole-array path does not fit VMEM"

        out = pl.pallas_call(
            _fused_mlp_kernel,
            out_shape=jax.ShapeDtypeStruct((Bp, Op), x.dtype),
            in_specs=[pl.BlockSpec(memory_space=pltpu.VMEM) for _ in flat_args],
            out_specs=pl.BlockSpec(memory_space=pltpu.VMEM),
            compiler_params=pltpu.CompilerParams(vmem_limit_bytes=vmem_limit),
        )(*flat_args)
        return out[:B, :out_dim]

    # -------- large-batch path: tile M, "parallel" for v7x's 2 TensorCores ---
    Bp = _round_up(B, tm)
    xp = _pad2d(x, Bp, Ip)
    flat_args = [xp] + flat_params
    grid = (Bp // tm,)

    in_specs = [pl.BlockSpec((tm, Ip), lambda i: (i, 0))]
    for w, b in padded_params:
        # Constant index_map -> weights/biases fetched once, resident across steps.
        in_specs.append(pl.BlockSpec(w.shape, lambda i: (0, 0)))
        in_specs.append(pl.BlockSpec(b.shape, lambda i: (0, 0)))
    out_specs = pl.BlockSpec((tm, Op), lambda i: (i, 0))

    # VMEM budget derived against v7x's 64 MiB, counting default 2x buffering.
    per_step_bytes = (tm * Ip + tm * Op) * itemsize       # x tile + out tile
    needed = 2 * per_step_bytes + 2 * weight_bytes + tm * max_width * 4
    vmem_limit = int(min(max(2 * needed, 32 << 20), 64 << 20))
    assert needed <= vmem_limit, "M-tiled fused path does not fit VMEM; shrink tm"

    out = pl.pallas_call(
        _fused_mlp_kernel,
        out_shape=jax.ShapeDtypeStruct((Bp, Op), x.dtype),
        grid=grid,
        in_specs=in_specs,
        out_specs=out_specs,
        compiler_params=pltpu.CompilerParams(
            dimension_semantics=("parallel",),
            vmem_limit_bytes=vmem_limit,
        ),
    )(*flat_args)
    return out[:B, :out_dim]


def linear_mlp_forward(x, padded_params, dims, dims_p):
    # Sequential of Linear layers, no nonlinearity (matches the PyTorch module),
    # executed as ONE fused Pallas kernel.
    return fused_linear_mlp(x, padded_params, dims, dims_p)


if __name__ == "__main__":
    key = jax.random.PRNGKey(0)
    layer_dim = [32, 64, 16]   # small MLP: 32 -> 64 -> 16
    batch = 8

    kx, kp, kx2 = jax.random.split(key, 3)
    params = init_linear_params(kp, layer_dim)
    padded_params, dims, dims_p = prepare_params(params)   # padding hoisted to init

    # ---- small-batch (gridless) path -------------------------------------
    x = jax.random.normal(kx, (batch, layer_dim[0]), dtype=jnp.float32)
    out = jax.block_until_ready(linear_mlp_forward(x, padded_params, dims, dims_p))

    ref = x
    for w_t, b in params:
        ref = ref @ w_t + b
    assert out.shape == (batch, layer_dim[-1])
    assert jnp.allclose(out, ref, atol=1e-5, rtol=1e-5)

    # ---- large-batch (M-tiled, parallel grid) path ------------------------
    big_batch = 512
    x2 = jax.random.normal(kx2, (big_batch, layer_dim[0]), dtype=jnp.float32)
    out2 = jax.block_until_ready(linear_mlp_forward(x2, padded_params, dims, dims_p))

    ref2 = x2
    for w_t, b in params:
        ref2 = ref2 @ w_t + b
    assert out2.shape == (big_batch, layer_dim[-1])
    assert jnp.allclose(out2, ref2, atol=1e-5, rtol=1e-5)

    print("KERNEL_OK")
</pallas_src>

<mosaic_0001>
module attributes {stable_mosaic.version = 11 : i64} {
  func.func @_fused_mlp_kernel(%arg0: memref<8x128xf32, #tpu.memory_space<vmem>>, %arg1: memref<128x128xf32, #tpu.memory_space<vmem>>, %arg2: memref<1x128xf32, #tpu.memory_space<vmem>>, %arg3: memref<128x128xf32, #tpu.memory_space<vmem>>, %arg4: memref<1x128xf32, #tpu.memory_space<vmem>>, %arg5: memref<8x128xf32, #tpu.memory_space<vmem>>) attributes {dimension_semantics = [], scalar_prefetch = 0 : i64, scratch_operands = 0 : i64, tpu.core_type = #tpu.core_type<tc>} {
    %c0 = arith.constant 0 : index
    %c0_0 = arith.constant 0 : index
    %0 = vector.load %arg0[%c0, %c0_0] : memref<8x128xf32, #tpu.memory_space<vmem>>, vector<8x128xf32>
    %c0_1 = arith.constant 0 : index
    %c0_2 = arith.constant 0 : index
    %1 = vector.load %arg1[%c0_1, %c0_2] : memref<128x128xf32, #tpu.memory_space<vmem>>, vector<128x128xf32>
    %c0_3 = arith.constant 0 : index
    %c0_4 = arith.constant 0 : index
    %2 = vector.load %arg2[%c0_3, %c0_4] : memref<1x128xf32, #tpu.memory_space<vmem>>, vector<1x128xf32>
    %cst = arith.constant dense<0.000000e+00> : vector<8x128xf32>
    %3 = tpu.matmul %0, %1, %cst {dimension_numbers = #tpu.dot_dimension_numbers<[1], [0], [0], [1], [0, 0, 1, 1], [], []>, precision = #tpu.contract_precision<fp32>} : vector<8x128xf32>, vector<128x128xf32>, vector<8x128xf32> -> vector<8x128xf32>
    %4 = vector.broadcast %2 : vector<1x128xf32> to vector<8x128xf32>
    %5 = arith.addf %3, %4 : vector<8x128xf32>
    %c0_5 = arith.constant 0 : index
    %c0_6 = arith.constant 0 : index
    %6 = vector.load %arg3[%c0_5, %c0_6] : memref<128x128xf32, #tpu.memory_space<vmem>>, vector<128x128xf32>
    %c0_7 = arith.constant 0 : index
    %c0_8 = arith.constant 0 : index
    %7 = vector.load %arg4[%c0_7, %c0_8] : memref<1x128xf32, #tpu.memory_space<vmem>>, vector<1x128xf32>
    %cst_9 = arith.constant dense<0.000000e+00> : vector<8x128xf32>
    %8 = tpu.matmul %5, %6, %cst_9 {dimension_numbers = #tpu.dot_dimension_numbers<[1], [0], [0], [1], [0, 0, 1, 1], [], []>, precision = #tpu.contract_precision<fp32>} : vector<8x128xf32>, vector<128x128xf32>, vector<8x128xf32> -> vector<8x128xf32>
    %9 = vector.broadcast %7 : vector<1x128xf32> to vector<8x128xf32>
    %10 = arith.addf %8, %9 : vector<8x128xf32>
    %c0_10 = arith.constant 0 : index
    %c0_11 = arith.constant 0 : index
    %11 = vector.load %arg5[%c0_10, %c0_11] : memref<8x128xf32, #tpu.memory_space<vmem>>, vector<8x128xf32>
    tpu.vector_store %arg5[%c0_10, %c0_11], %10 {strides = array<i32>} : memref<8x128xf32, #tpu.memory_space<vmem>>, vector<8x128xf32>,
    return
  }
}

</mosaic_0001>

<bundles_post_ra>
// kernel: tpu_custom_call.1
= control target key start
LH: loop header
LB: loop body
LE: loop exit
PB: predicated region body
PF: predicated region fallthrough
CT: control target
= control target key end

     0   :  { %10 = vsyncpa [#allocation3], 0  ;;  %s3016_s0 = inlined_call_operand.hbm [shape: f32[8,128], index: 0, kind: input, shape index: {}]   ;;  %s3017_s1 = inlined_call_operand.hbm [shape: f32[128,128], index: 1, kind: input, shape index: {}]   ;;  %s3018_s2 = inlined_call_operand.vmem [shape: f32[1,128], index: 2, kind: input, shape index: {}]   ;;  %s3019_s3 = inlined_call_operand.hbm [shape: f32[128,128], index: 3, kind: input, shape index: {}]   ;;  %s3020_s4 = inlined_call_operand.vmem [shape: f32[1,128], index: 4, kind: input, shape index: {}]   ;;  %s3021_s5 = inlined_call_operand.hbm [shape: f32[8,128], index: 5, kind: output, shape index: {}]  }
   0x1   :  { %11 = vsyncpa [#allocation6], 0 }
   0x2   :  { %12 = vsyncpa [#allocation4], 0  ;;  %s2445_s18 = smov [#allocation5]   ;;  %s2351_s22 = scalar_lea.hbm %s3017_s1, 2048 }
   0x3   :  { %s28_s19 = sshll.u32 %s2445_s18, 4  ;;  %p2352_p0 = scmp.ne.s32.totalorder %s3017_s1, %s2351_s22  ;;  %s29_s19 = int_to_ptr.vmem [resolvable:$true] %s28_s19 }
   0x4   :  { %p2355_p1 = scmp.lt.u32.totalorder %s2351_s22, %s3017_s1 }
   0x6   :  { %p2357_p2 = pnand %p2355_p1, %p2352_p0 }
   0x8   :  { %2360 = shalt.err (!%p2357_p2)
}
   0x9   :  { %s2361_s27 = scalar_lea.vmem %s29_s19, 2048  ;;  %p2366_p4 = scmp.lt.s32.totalorder %s29_s19, %s29_s19 }
   0xa   :  { %p2362_p3 = scmp.ne.s32.totalorder %s29_s19, %s2361_s27  ;;  %p2367_p5 = scmp.lt.s32.totalorder %s2361_s27, %s2361_s27 }
   0xc   :  { %p2368_p6 = por %p2367_p5, %p2366_p4 }
   0xe   :  { %p2369_p7 = pnand %p2368_p6, %p2362_p3 }
  0x10   :  { %2372 = shalt.err (!%p2369_p7)
}
  0x11   :  { %s2446_s28 = smov 128   ;;  %s2447_s29 = smov 8  }
  0x12   :  { %34 = dma.hbm_to_vmem [thread:$0]  %s3017_s1, 2048, %s29_s19, [#allocation6], %s2446_s28, %s2446_s28, %s2447_s29  }
  0x13   :  { %s2448_s7 = smov [#allocation2]   ;;  %s2449_s9 = smov [#allocation7]  }
  0x14   :  { %s19_s8 = sshll.u32 %s2448_s7, 4  ;;  %s42_s10 = sshll.u32 %s2449_s9, 4  ;;  %s20_s8 = int_to_ptr.vmem [resolvable:$true] %s19_s8  ;;  %s43_s10 = int_to_ptr.vmem [resolvable:$true] %s42_s10 }
  0x15   :  { %s2373_s13 = scalar_lea.hbm %s3016_s0, 128 }
  0x16   :  { %p2374_p8 = scmp.ne.s32.totalorder %s3016_s0, %s2373_s13  ;;  %p2377_p9 = scmp.lt.u32.totalorder %s2373_s13, %s3016_s0 }
  0x18   :  { %p2379_p10 = pnand %p2377_p9, %p2374_p8 }
  0x1a   :  { %2382 = shalt.err (!%p2379_p10)
}
  0x1b   :  { %s2383_s1 = scalar_lea.vmem %s20_s8, 128  ;;  %p2388_p12 = scmp.lt.s32.totalorder %s20_s8, %s20_s8 }
  0x1c   :  { %p2384_p11 = scmp.ne.s32.totalorder %s20_s8, %s2383_s1  ;;  %p2389_p13 = scmp.lt.s32.totalorder %s2383_s1, %s2383_s1 }
  0x1e   :  { %p2390_p0 = por %p2389_p13, %p2388_p12 }
  0x20   :  { %p2391_p1 = pnand %p2390_p0, %p2384_p11 }
  0x22   :  { %2394 = shalt.err (!%p2391_p1)
}
  0x23   :  { %22 = dma.hbm_to_vmem [thread:$0]  %s3016_s0, 128, %s20_s8, [#allocation3]  }
  0x24   :  { %s2395_s22 = scalar_lea.hbm %s3019_s3, 2048 }
  0x25   :  { %p2396_p2 = scmp.ne.s32.totalorder %s3019_s3, %s2395_s22  ;;  %p2399_p3 = scmp.lt.u32.totalorder %s2395_s22, %s3019_s3 }
  0x27   :  { %p2401_p4 = pnand %p2399_p3, %p2396_p2 }
  0x29   :  { %2404 = shalt.err (!%p2401_p4)
}
  0x2a   :  { %s2405_s27 = scalar_lea.vmem %s43_s10, 2048  ;;  %p2410_p6 = scmp.lt.s32.totalorder %s43_s10, %s43_s10 }
  0x2b   :  { %p2406_p5 = scmp.ne.s32.totalorder %s43_s10, %s2405_s27  ;;  %p2411_p7 = scmp.lt.s32.totalorder %s2405_s27, %s2405_s27 }
  0x2d   :  { %p2412_p8 = por %p2411_p7, %p2410_p6 }
  0x2f   :  { %p2413_p9 = pnand %p2412_p8, %p2406_p5 }
  0x31   :  { %2416 = shalt.err (!%p2413_p9)
}
  0x32   :  { %48 = dma.hbm_to_vmem [thread:$0]  %s3019_s3, 2048, %s43_s10, [#allocation6], %s2446_s28, %s2446_s28, %s2447_s29  }
  0x33   :  { %2439 = dma.done.wait [#allocation3], 128  }
  0x34   :  { %2440 = vsyncadd [#allocation3], 4294967168 }
  0x35   :  { %2441 = dma.done.wait [#allocation6], 4096  }
  0x36   :  { %2442 = vsyncadd [#allocation6], 4294963200  ;;  %v2450_v0 = vmov 0.0|0.0   ;;  %vm2451_vm0 = vmmov 0   ;;  %v2452_v1 = vmov 0.0   ;;  %v61_v2 = vld [vmem:[#allocation5] sm:$0xff] }
  0x37   :  { %2032 = vmatprep.subr.bf16.mxu0 %v2450_v0  ;;  %1644 = vmatprep.mubr.msk.f32.mxu0 %vm2451_vm0, %v2452_v1  ;;  %v62_v3 = vld [vmem:[#allocation5 + $0x8] sm:$0xff]  ;;  %v63_v4 = vld [vmem:[#allocation5 + $0x10] sm:$0xff]  ;;  %v85_v5 = vand.u32 4294901760, %v61_v2  ;;  %v64_v7 = vld [vmem:[#allocation5 + $0x18] sm:$0xff]  ;;  %s2453_s6 = smov [#allocation8]  }
  0x38   :  { %2176 = vmatprep.subr.bf16.mxu1 %v2450_v0  ;;  %1854 = vmatprep.mubr.msk.f32.mxu1 %vm2451_vm0, %v2452_v1  ;;  %v88_v6 = vand.u32 4294901760, %v62_v3  ;;  %v91_v8 = vand.u32 4294901760, %v63_v4  ;;  %v94_v9 = vand.u32 4294901760, %v64_v7  ;;  %v65_v10 = vld [vmem:[#allocation5 + $0x20] sm:$0xff]  ;;  %v66_v11 = vld [vmem:[#allocation5 + $0x28] sm:$0xff]  ;;  %v67_v16 = vld [vmem:[#allocation5 + $0x30] sm:$0xff] }
  0x39   :  { %v97_v14 = vand.u32 4294901760, %v65_v10  ;;  %v100_v15 = vand.u32 4294901760, %v66_v11  ;;  %v68_v17 = vld [vmem:[#allocation5 + $0x38] sm:$0xff]  ;;  %v103_v19 = vand.u32 4294901760, %v67_v16  ;;  %v69_v21 = vld [vmem:[#allocation5 + $0x40] sm:$0xff]  ;;  %v70_v22 = vld [vmem:[#allocation5 + $0x48] sm:$0xff]  ;;  %v2542_v24 = vsub.f32 %v61_v2, %v85_v5 }
  0x3a   :  { %v2532_v12 = vpack.c.bf16 %v88_v6, %v85_v5  ;;  %v2535_v13 = vpack.c.bf16 %v94_v9, %v91_v8  ;;  %v106_v20 = vand.u32 4294901760, %v68_v17  ;;  %v60_v23 = vld [vmem:[#allocation2] sm:$0xff]  ;;  %v2544_v25 = vsub.f32 %v62_v3, %v88_v6  ;;  %v71_v29 = vld [vmem:[#allocation5 + $0x50] sm:$0xff]  ;;  %v73_v32 = vld [vmem:[#allocation5 + $0x60] sm:$0xff]  ;;  %s1396_s7 = sshll.u32 %s2453_s6, 4  ;;  %s1397_s7 = int_to_ptr.vmem [resolvable:$true] %s1396_s7 }
  0x3b   :  { %v2539_v18 = vpack.c.bf16 %v100_v15, %v97_v14  ;;  %v109_v27 = vand.u32 4294901760, %v69_v21  ;;  %v112_v28 = vand.u32 4294901760, %v70_v22  ;;  %v72_v30 = vld [vmem:[#allocation5 + $0x58] sm:$0xff]  ;;  %v2550_v31 = vand.u32 4294901760, %v60_v23  ;;  %v74_v35 = vld [vmem:[#allocation5 + $0x68] sm:$0xff]  ;;  %v75_v36 = vld [vmem:[#allocation5 + $0x70] sm:$0xff]  ;;  %p2422_p11 = scmp.lt.s32.totalorder %s1397_s7, %s1397_s7 }
  0x3c   :  { %2034 = vmatpush3.bf16.msra.mxu0 %v2532_v12  ;;  %v2547_v26 = vpack.c.bf16 %v106_v20, %v103_v19  ;;  %v2552_v33 = vsub.f32 %v63_v4, %v91_v8  ;;  %v115_v34 = vand.u32 4294901760, %v71_v29  ;;  %v76_v37 = vld [vmem:[#allocation5 + $0x78] sm:$0xff]  ;;  %v118_v39 = vand.u32 4294901760, %v72_v30  ;;  %s2417_s8 = scalar_lea.vmem %s1397_s7, 128 }
  0x3d   :  { %2035 = vmatprep.subr.bf16.mxu0 %v2450_v0  ;;  %v2555_v38 = vpack.c.bf16 %v112_v28, %v109_v27  ;;  %v178_v40 = vand.u32 4294901760, %v2542_v24  ;;  %v185_v41 = vand.u32 4294901760, %v2544_v25  ;;  %v2559_v42 = vsub.f32 %v64_v7, %v94_v9  ;;  %p2418_p10 = scmp.ne.s32.totalorder %s1397_s7, %s2417_s8  ;;  %p2423_p12 = scmp.lt.s32.totalorder %s2417_s8, %s2417_s8 }
  0x3e   :  { %v2561_v43 = vsub.f32 %v65_v10, %v97_v14  ;;  %v2563_v44 = vsub.f32 %v66_v11, %v100_v15  ;;  %v2567_v45 = vsub.f32 %v60_v23, %v2550_v31  ;;  %v121_v46 = vand.u32 4294901760, %v73_v32 }
  0x3f   :  { %v124_v47 = vand.u32 4294901760, %v74_v35  ;;  %v127_v48 = vand.u32 4294901760, %v75_v36  ;;  %v130_v49 = vand.u32 4294901760, %v76_v37  ;;  %v2569_v50 = vsub.f32 %v67_v16, %v103_v19  ;;  %p2424_p13 = por %p2423_p12, %p2422_p11 }
  0x40   :  { %2037 = vmatpush3.bf16.msra.mxu0 %v2535_v13  ;;  %v2571_v51 = vsub.f32 %v68_v17, %v106_v20  ;;  %v2573_v52 = vsub.f32 %v69_v21, %v109_v27  ;;  %v192_v53 = vand.u32 4294901760, %v2552_v33  ;;  %v2577_v54 = vsub.f32 %v70_v22, %v112_v28 }
  0x41   :  { %2038 = vmatprep.subr.bf16.mxu0 %v2450_v0  ;;  %v2579_v55 = vpack.c.bf16 %v118_v39, %v115_v34  ;;  %v179_v56 = vsub.f32 %v2542_v24, %v178_v40  ;;  %v186_v57 = vsub.f32 %v2544_v25, %v185_v41  ;;  %v2584_v58 = vsub.f32 %v71_v29, %v115_v34  ;;  %p2425_p0 = pnand %p2424_p13, %p2418_p10 }
  0x42   :  { %v2586_v59 = vsub.f32 %v72_v30, %v118_v39  ;;  %v2588_v60 = vsub.f32 %v73_v32, %v121_v46  ;;  %v167_v61 = vand.u32 4294901760, %v2567_v45  ;;  %v2591_v62 = vpack.c.bf16 %v124_v47, %v121_v46 }
  0x43   :  { %v2593_v63 = vsub.f32 %v74_v35, %v124_v47  ;;  %v2595_v2 = vpack.c.bf16 %v130_v49, %v127_v48  ;;  %v2597_v3 = vsub.f32 %v75_v36, %v127_v48  ;;  %v2599_v4 = vsub.f32 %v76_v37, %v130_v49 }
  0x44   :  { %2040 = vmatpush3.bf16.msra.mxu0 %v2539_v18  ;;  %v193_v5 = vsub.f32 %v2552_v33, %v192_v53  ;;  %v199_v6 = vand.u32 4294901760, %v2559_v42  ;;  %v206_v7 = vand.u32 4294901760, %v2561_v43  ;;  %v180_v8 = vand.u32 4294901760, %v179_v56 }
  0x45   :  { %2041 = vmatprep.subr.bf16.mxu0 %v2450_v0  ;;  %v187_v9 = vand.u32 4294901760, %v186_v57  ;;  %v213_v10 = vand.u32 4294901760, %v2563_v44  ;;  %v220_v11 = vand.u32 4294901760, %v2569_v50  ;;  %v168_v14 = vsub.f32 %v2567_v45, %v167_v61 }
  0x46   :  { %v227_v15 = vand.u32 4294901760, %v2571_v51  ;;  %v234_v16 = vand.u32 4294901760, %v2573_v52  ;;  %v241_v17 = vand.u32 4294901760, %v2577_v54  ;;  %v248_v19 = vand.u32 4294901760, %v2584_v58 }
  0x47   :  { %v255_v20 = vand.u32 4294901760, %v2586_v59  ;;  %v262_v21 = vand.u32 4294901760, %v2588_v60  ;;  %v269_v22 = vand.u32 4294901760, %v2593_v63  ;;  %v276_v23 = vand.u32 4294901760, %v2597_v3 }
  0x48   :  { %2043 = vmatpush3.bf16.msra.mxu0 %v2547_v26  ;;  %v283_v27 = vand.u32 4294901760, %v2599_v4  ;;  %v2620_v28 = vpack.c.bf16 %v185_v41, %v178_v40  ;;  %v2622_v29 = vpack.c.bf16 %v199_v6, %v192_v53  ;;  %v200_v30 = vsub.f32 %v2559_v42, %v199_v6 }
  0x49   :  { %2044 = vmatprep.subr.bf16.mxu0 %v2450_v0  ;;  %v2626_v32 = vpack.c.bf16 %v213_v10, %v206_v7  ;;  %v2628_v34 = vpack.c.bf16 %v227_v15, %v220_v11  ;;  %v2630_v35 = vpack.c.bf16 %v241_v17, %v234_v16  ;;  %v2633_v36 = vpack.c.bf16 %v255_v20, %v248_v19 }
  0x4a   :  { %v2635_v37 = vpack.c.bf16 %v269_v22, %v262_v21  ;;  %v2637_v39 = vpack.c.bf16 %v283_v27, %v276_v23  ;;  %v169_v40 = vand.u32 4294901760, %v168_v14  ;;  %v194_v41 = vand.u32 4294901760, %v193_v5 }
  0x4b   :  { %v2057_v46 = vpack.c.bf16 %v187_v9, %v180_v8  ;;  %v201_v47 = vand.u32 4294901760, %v200_v30  ;;  %v207_v48 = vsub.f32 %v2561_v43, %v206_v7  ;;  %v214_v49 = vsub.f32 %v2563_v44, %v213_v10 }
  0x4c   :  { %2046 = vmatpush3.bf16.msra.mxu0 %v2555_v38  ;;  %v221_v53 = vsub.f32 %v2569_v50, %v220_v11  ;;  %v228_v14 = vsub.f32 %v2571_v51, %v227_v15  ;;  %v235_v5 = vsub.f32 %v2573_v52, %v234_v16  ;;  %v242_v10 = vsub.f32 %v2577_v54, %v241_v17 }
  0x4d   :  { %2047 = vmatprep.subr.bf16.mxu0 %v2450_v0  ;;  %v2060_v56 = vpack.c.bf16 %v201_v47, %v194_v41  ;;  %v208_v57 = vand.u32 4294901760, %v207_v48  ;;  %v215_v6 = vand.u32 4294901760, %v214_v49  ;;  %v249_v15 = vsub.f32 %v2584_v58, %v248_v19 }
  0x4e   :  { %v222_v8 = vand.u32 4294901760, %v221_v53  ;;  %v229_v9 = vand.u32 4294901760, %v228_v14  ;;  %v236_v11 = vand.u32 4294901760, %v235_v5  ;;  %v256_v41 = vsub.f32 %v2586_v59, %v255_v20  ;;  %v727_v5 = vld [vmem:[#allocation7 + $0x10] sm:$0xff] }
  0x4f   :  { %v2063_v7 = vpack.c.bf16 %v215_v6, %v208_v57  ;;  %v263_v16 = vsub.f32 %v2588_v60, %v262_v21  ;;  %v250_v47 = vand.u32 4294901760, %v249_v15  ;;  %v270_v17 = vsub.f32 %v2593_v63, %v269_v22 }
  0x50   :  { %2049 = vmatpush3.bf16.msra.mxu0 %v2579_v55  ;;  %v2066_v30 = vpack.c.bf16 %v229_v9, %v222_v8  ;;  %v257_v48 = vand.u32 4294901760, %v256_v41  ;;  %v277_v19 = vsub.f32 %v2597_v3, %v276_v23  ;;  %v284_v20 = vsub.f32 %v2599_v4, %v283_v27  ;;  %v725_v23 = vld [vmem:[#allocation7] sm:$0xff]  ;;  %v726_v27 = vld [vmem:[#allocation7 + $0x8] sm:$0xff]  ;;  %v731_v41 = vld [vmem:[#allocation7 + $0x30] sm:$0xff] }
  0x51   :  { %2050 = vmatprep.subr.bf16.mxu0 %v2450_v0  ;;  %v264_v49 = vand.u32 4294901760, %v263_v16  ;;  %v2081_v14 = vpack.c.bf16 %v2544_v25, %v2542_v24  ;;  %v749_v8 = vand.u32 4294901760, %v725_v23  ;;  %v752_v9 = vand.u32 4294901760, %v726_v27  ;;  %v730_v24 = vld [vmem:[#allocation7 + $0x28] sm:$0xff]  ;;  %v732_v16 = vld [vmem:[#allocation7 + $0x38] sm:$0xff] }
  0x52   :  { %v2072_v53 = vpack.c.bf16 %v257_v48, %v250_v47  ;;  %v278_v57 = vand.u32 4294901760, %v277_v19  ;;  %v285_v6 = vand.u32 4294901760, %v284_v20  ;;  %v764_v15 = vand.u32 4294901760, %v730_v24 }
  0x53   :  { %v2671_v47 = vpack.c.bf16 %v752_v9, %v749_v8 }
  0x54   :  { %2052 = vmatpush3.bf16.msra.mxu0 %v2591_v62  ;;  %v2078_v22 = vpack.c.bf16 %v285_v6, %v278_v57  ;;  %v2688_v20 = vsub.f32 %v730_v24, %v764_v15  ;;  %v770_v57 = vand.u32 4294901760, %v732_v16 }
  0x55   :  { %2053 = vmatprep.subr.bf16.mxu0 %v2450_v0  ;;  %2178 = vmatpush3.bf16.msra.mxu1 %v2671_v47 }
  0x56   :  { %2179 = vmatprep.subr.bf16.mxu1 %v2450_v0 }
  0x58   :  { %2055 = vmatpush3.bf16.msra.mxu0 %v2595_v2 }
  0x59   :  { %2056 = vmatprep.subr.bf16.mxu0 %v2450_v0 }
  0x5b   :  { %1645 = vmatmul.mubr.f32.vlgmr.msra.gmra.mrb[0].mxu0 %v169_v40  ;;  %v243_v40 = vand.u32 4294901760, %v242_v10  ;;  %v728_v10 = vld [vmem:[#allocation7 + $0x18] sm:$0xff] }
  0x5c   :  { %2058 = vmatpush3.bf16.msra.mxu0 %v2057_v46  ;;  %1679 = vmatprep.mubr.msk.f32.mxu0 %vm2451_vm0, %v2452_v1  ;;  %v758_v25 = vand.u32 4294901760, %v728_v10 }
  0x5d   :  { %2059 = vmatprep.subr.bf16.mxu0 %v2450_v0  ;;  %v2069_v46 = vpack.c.bf16 %v243_v40, %v236_v11  ;;  %v755_v11 = vand.u32 4294901760, %v727_v5 }
  0x5f   :  { %v2677_v48 = vsub.f32 %v727_v5, %v755_v11 }
  0x60   :  { %2061 = vmatpush3.bf16.msra.mxu0 %v2060_v56  ;;  %v271_v56 = vand.u32 4294901760, %v270_v17  ;;  %v734_v17 = vld [vmem:[#allocation7 + $0x48] sm:$0xff] }
  0x61   :  { %2062 = vmatprep.subr.bf16.mxu0 %v2450_v0 }
  0x62   :  { %v2075_v21 = vpack.c.bf16 %v271_v56, %v264_v49  ;;  %v2087_v49 = vpack.c.bf16 %v2563_v44, %v2561_v43  ;;  %v2683_v56 = vsub.f32 %v728_v10, %v758_v25  ;;  %v2694_v44 = vsub.f32 %v732_v16, %v770_v57 }
  0x63   :  { %v856_v10 = vand.u32 4294901760, %v2677_v48 }
  0x64   :  { %2064 = vmatpush3.bf16.msra.mxu0 %v2063_v7  ;;  %v2084_v7 = vpack.c.bf16 %v2559_v42, %v2552_v33  ;;  %v2673_v33 = vsub.f32 %v725_v23, %v749_v8  ;;  %v2675_v42 = vsub.f32 %v726_v27, %v752_v9  ;;  %v2090_v27 = vpack.c.bf16 %v2571_v51, %v2569_v50 }
  0x65   :  { %2065 = vmatprep.subr.bf16.mxu0 %v2450_v0  ;;  %v2096_v50 = vpack.c.bf16 %v2586_v59, %v2584_v58  ;;  %v738_v58 = vld [vmem:[#allocation7 + $0x68] sm:$0xff]  ;;  %v857_v24 = vsub.f32 %v2677_v48, %v856_v10 }
  0x66   :  { %v788_v59 = vand.u32 4294901760, %v738_v58 }
  0x68   :  { %2067 = vmatpush3.bf16.msra.mxu0 %v2066_v30  ;;  %v729_v30 = vld [vmem:[#allocation7 + $0x20] sm:$0xff] }
  0x69   :  { %2068 = vmatprep.subr.bf16.mxu0 %v2450_v0  ;;  %v761_v40 = vand.u32 4294901760, %v729_v30 }
  0x6b   :  { %v2685_v19 = vsub.f32 %v729_v30, %v761_v40  ;;  %v2703_v5 = vpack.c.bf16 %v764_v15, %v761_v40  ;;  %v858_v15 = vand.u32 4294901760, %v857_v24 }
  0x6c   :  { %2070 = vmatpush3.bf16.msra.mxu0 %v2069_v46  ;;  %v733_v46 = vld [vmem:[#allocation7 + $0x40] sm:$0xff] }
  0x6d   :  { %2071 = vmatprep.subr.bf16.mxu0 %v2450_v0  ;;  %v773_v6 = vand.u32 4294901760, %v733_v46  ;;  %v870_v16 = vand.u32 4294901760, %v2685_v19 }
  0x70   :  { %2073 = vmatpush3.bf16.msra.mxu0 %v2072_v53  ;;  %v2681_v53 = vpack.c.bf16 %v758_v25, %v755_v11  ;;  %v863_v11 = vand.u32 4294901760, %v2683_v56 }
  0x71   :  { %2074 = vmatprep.subr.bf16.mxu0 %v2450_v0 }
  0x72   :  { %2181 = vmatpush3.bf16.msra.mxu1 %v2681_v53  ;;  %v864_v25 = vsub.f32 %v2683_v56, %v863_v11 }
  0x73   :  { %2182 = vmatprep.subr.bf16.mxu1 %v2450_v0 }
  0x74   :  { %2076 = vmatpush3.bf16.msra.mxu0 %v2075_v21  ;;  %v767_v21 = vand.u32 4294901760, %v731_v41 }
  0x75   :  { %2077 = vmatprep.subr.bf16.mxu0 %v2450_v0 }
  0x76   :  { %v2692_v43 = vsub.f32 %v731_v41, %v767_v21  ;;  %2184 = vmatpush3.bf16.msra.mxu1 %v2703_v5  ;;  %v2710_v8 = vpack.c.bf16 %v770_v57, %v767_v21  ;;  %v865_v41 = vand.u32 4294901760, %v864_v25 }
  0x77   :  { %2185 = vmatprep.subr.bf16.mxu1 %v2450_v0 }
  0x78   :  { %2079 = vmatpush3.bf16.msra.mxu0 %v2078_v22  ;;  %v776_v22 = vand.u32 4294901760, %v734_v17 }
  0x79   :  { %2080 = vmatprep.subr.bf16.mxu0 %v2450_v0 }
  0x7a   :  { %v2698_v23 = vsub.f32 %v734_v17, %v776_v22  ;;  %2187 = vmatpush3.bf16.msra.mxu1 %v2710_v8  ;;  %v2717_v51 = vpack.c.bf16 %v776_v22, %v773_v6  ;;  %v2204_v17 = vpack.c.bf16 %v865_v41, %v858_v15  ;;  %v884_v22 = vand.u32 4294901760, %v2692_v43 }
  0x7b   :  { %1680 = vmatmul.mubr.f32.vlgmr.msra.gmra.mrb[0].mxu0 %v2550_v31  ;;  %2188 = vmatprep.subr.bf16.mxu1 %v2450_v0 }
  0x7c   :  { %2082 = vmatpush3.bf16.msra.mxu0 %v2081_v14  ;;  %1714 = vmatprep.mubr.msk.f32.mxu0 %vm2451_vm0, %v2452_v1  ;;  %v2696_v14 = vsub.f32 %v733_v46, %v773_v6  ;;  %v877_v46 = vand.u32 4294901760, %v2688_v20 }
  0x7d   :  { %2083 = vmatprep.subr.bf16.mxu0 %v2450_v0 }
  0x7e   :  { %2190 = vmatpush3.bf16.msra.mxu1 %v2717_v51  ;;  %v878_v21 = vsub.f32 %v2688_v20, %v877_v46 }
  0x7f   :  { %2191 = vmatprep.subr.bf16.mxu1 %v2450_v0 }
  0x80   :  { %2085 = vmatpush3.bf16.msra.mxu0 %v2084_v7  ;;  %v2093_v7 = vpack.c.bf16 %v2577_v54, %v2573_v52  ;;  %v2099_v52 = vpack.c.bf16 %v2593_v63, %v2588_v60  ;;  %v2102_v54 = vpack.c.bf16 %v2599_v4, %v2597_v3  ;;  %v2801_v3 = vsub.f32 %v738_v58, %v788_v59 }
  0x81   :  { %2086 = vmatprep.subr.bf16.mxu0 %v2450_v0  ;;  %v879_v6 = vand.u32 4294901760, %v878_v21 }
  0x82   :  { %v3024_v24 = vand.u32 4294901760, %v2801_v3 }
  0x84   :  { %2088 = vmatpush3.bf16.msra.mxu0 %v2087_v49  ;;  %v871_v49 = vsub.f32 %v2685_v19, %v870_v16  ;;  %v934_v41 = vsub.f32 %v2801_v3, %v3024_v24 }
  0x85   :  { %2089 = vmatprep.subr.bf16.mxu0 %v2450_v0 }
  0x86   :  { %v872_v57 = vand.u32 4294901760, %v871_v49  ;;  %v935_v21 = vand.u32 4294901760, %v934_v41 }
  0x88   :  { %2091 = vmatpush3.bf16.msra.mxu0 %v2090_v27  ;;  %v891_v27 = vand.u32 4294901760, %v2694_v44 }
  0x89   :  { %2092 = vmatprep.subr.bf16.mxu0 %v2450_v0 }
  0x8c   :  { %2094 = vmatpush3.bf16.msra.mxu0 %v2093_v7  ;;  %v2207_v7 = vpack.c.bf16 %v879_v6, %v872_v57 }
  0x8d   :  { %2095 = vmatprep.subr.bf16.mxu0 %v2450_v0 }
  0x90   :  { %2097 = vmatpush3.bf16.msra.mxu0 %v2096_v50  ;;  %v885_v50 = vsub.f32 %v2692_v43, %v884_v22 }
  0x91   :  { %2098 = vmatprep.subr.bf16.mxu0 %v2450_v0 }
  0x94   :  { %2100 = vmatpush3.bf16.msra.mxu0 %v2099_v52  ;;  %v892_v52 = vsub.f32 %v2694_v44, %v891_v27 }
  0x95   :  { %2101 = vmatprep.subr.bf16.mxu0 %v2450_v0 }
  0x98   :  { %2103 = vmatpush3.bf16.msra.mxu0 %v2102_v54  ;;  %v886_v54 = vand.u32 4294901760, %v885_v50 }
  0x99   :  { %2104 = vmatprep.subr.bf16.mxu0 %v2450_v0 }
  0x9b   :  { %1715 = vmatmul.mubr.f32.vlgmr.msra.gmra.mrb[0].mxu0 %v2567_v45 }
  0x9c   :  { %2106 = vmatpush3.bf16.msra.mxu0 %v2532_v12  ;;  %1749 = vmatprep.mubr.msk.f32.mxu0 %vm2451_vm0, %v2452_v1 }
  0x9d   :  { %2107 = vmatprep.subr.bf16.mxu0 %v2450_v0 }
  0xa0   :  { %2109 = vmatpush3.bf16.msra.mxu0 %v2535_v13 }
  0xa1   :  { %2110 = vmatprep.subr.bf16.mxu0 %v2450_v0 }
  0xa4   :  { %2112 = vmatpush3.bf16.msra.mxu0 %v2539_v18 }
  0xa5   :  { %2113 = vmatprep.subr.bf16.mxu0 %v2450_v0 }
  0xa8   :  { %2115 = vmatpush3.bf16.msra.mxu0 %v2547_v26 }
  0xa9   :  { %2116 = vmatprep.subr.bf16.mxu0 %v2450_v0 }
  0xac   :  { %2118 = vmatpush3.bf16.msra.mxu0 %v2555_v38 }
  0xad   :  { %2119 = vmatprep.subr.bf16.mxu0 %v2450_v0 }
  0xb0   :  { %2121 = vmatpush3.bf16.msra.mxu0 %v2579_v55 }
  0xb1   :  { %2122 = vmatprep.subr.bf16.mxu0 %v2450_v0 }
  0xb4   :  { %2124 = vmatpush3.bf16.msra.mxu0 %v2591_v62 }
  0xb5   :  { %2125 = vmatprep.subr.bf16.mxu0 %v2450_v0 }
  0xb8   :  { %2127 = vmatpush3.bf16.msra.mxu0 %v2595_v2 }
  0xb9   :  { %2128 = vmatprep.subr.bf16.mxu0 %v2450_v0 }
  0xbb   :  { %1750 = vmatmul.mubr.f32.vlgmr.msra.gmra.mrb[0].mxu0 %v167_v61  ;;  %v739_v61 = vld [vmem:[#allocation7 + $0x70] sm:$0xff] }
  0xbc   :  { %2130 = vmatpush3.bf16.msra.mxu0 %v2620_v28  ;;  %1784 = vmatprep.mubr.msk.f32.mxu0 %vm2451_vm0, %v2452_v1  ;;  %v791_v4 = vand.u32 4294901760, %v739_v61 }
  0xbd   :  { %2131 = vmatprep.subr.bf16.mxu0 %v2450_v0 }
  0xc0   :  { %2133 = vmatpush3.bf16.msra.mxu0 %v2622_v29  ;;  %v842_v29 = vand.u32 4294901760, %v2673_v33 }
  0xc1   :  { %2134 = vmatprep.subr.bf16.mxu0 %v2450_v0 }
  0xc4   :  { %2136 = vmatpush3.bf16.msra.mxu0 %v2626_v32  ;;  %v849_v32 = vand.u32 4294901760, %v2675_v42 }
  0xc5   :  { %2137 = vmatprep.subr.bf16.mxu0 %v2450_v0 }
  0xc8   :  { %2139 = vmatpush3.bf16.msra.mxu0 %v2628_v34 }
  0xc9   :  { %2140 = vmatprep.subr.bf16.mxu0 %v2450_v0 }
  0xcc   :  { %2142 = vmatpush3.bf16.msra.mxu0 %v2630_v35  ;;  %v2808_v35 = vsub.f32 %v739_v61, %v791_v4 }
  0xcd   :  { %2143 = vmatprep.subr.bf16.mxu0 %v2450_v0 }
  0xce   :  { %v3023_v57 = vand.u32 4294901760, %v2808_v35 }
  0xd0   :  { %2145 = vmatpush3.bf16.msra.mxu0 %v2633_v36 }
  0xd1   :  { %2146 = vmatprep.subr.bf16.mxu0 %v2450_v0 }
  0xd4   :  { %2148 = vmatpush3.bf16.msra.mxu0 %v2635_v37  ;;  %v843_v37 = vsub.f32 %v2673_v33, %v842_v29 }
  0xd5   :  { %2149 = vmatprep.subr.bf16.mxu0 %v2450_v0 }
  0xd6   :  { %v844_v9 = vand.u32 4294901760, %v843_v37 }
  0xd8   :  { %2151 = vmatpush3.bf16.msra.mxu0 %v2637_v39  ;;  %v850_v39 = vsub.f32 %v2675_v42, %v849_v32 }
  0xd9   :  { %2152 = vmatprep.subr.bf16.mxu0 %v2450_v0 }
  0xda   :  { %v851_v30 = vand.u32 4294901760, %v850_v39 }
  0xdb   :  { %1785 = vmatmul.mubr.f32.vlgmr.msra.gmra.mrb[0].mxu0 %v2550_v31 }
  0xdc   :  { %2154 = vmatpush3.bf16.msra.mxu0 %v2532_v12  ;;  %1819 = vmatprep.mubr.msk.f32.mxu0 %vm2451_vm0, %v2452_v1  ;;  %v735_v12 = vld [vmem:[#allocation7 + $0x50] sm:$0xff]  ;;  %v2828_v40 = vpack.c.bf16 %v851_v30, %v844_v9 }
  0xdd   :  { %2155 = vmatprep.subr.bf16.mxu0 %v2450_v0 }
  0xe0   :  { %2157 = vmatpush3.bf16.msra.mxu0 %v2535_v13  ;;  %v736_v13 = vld [vmem:[#allocation7 + $0x58] sm:$0xff] }
  0xe1   :  { %2158 = vmatprep.subr.bf16.mxu0 %v2450_v0 }
  0xe4   :  { %2160 = vmatpush3.bf16.msra.mxu0 %v2539_v18  ;;  %v779_v18 = vand.u32 4294901760, %v735_v12 }
  0xe5   :  { %2161 = vmatprep.subr.bf16.mxu0 %v2450_v0 }
  0xe6   :  { %v2794_v63 = vsub.f32 %v735_v12, %v779_v18  ;;  %v893_v12 = vand.u32 4294901760, %v892_v52  ;;  %v941_v52 = vsub.f32 %v2808_v35, %v3023_v57 }
  0xe8   :  { %2163 = vmatpush3.bf16.msra.mxu0 %v2547_v26  ;;  %v782_v26 = vand.u32 4294901760, %v736_v13  ;;  %v912_v61 = vand.u32 4294901760, %v2794_v63 }
  0xe9   :  { %2164 = vmatprep.subr.bf16.mxu0 %v2450_v0 }
  0xea   :  { %v2788_v45 = vpack.c.bf16 %v782_v26, %v779_v18  ;;  %v905_v18 = vand.u32 4294901760, %v2698_v23 }
  0xec   :  { %2166 = vmatpush3.bf16.msra.mxu0 %v2555_v38  ;;  %v737_v38 = vld [vmem:[#allocation7 + $0x60] sm:$0xff]  ;;  %2193 = vmatpush3.bf16.msra.mxu1 %v2788_v45  ;;  %v906_v58 = vsub.f32 %v2698_v23, %v905_v18 }
  0xed   :  { %2167 = vmatprep.subr.bf16.mxu0 %v2450_v0  ;;  %2194 = vmatprep.subr.bf16.mxu1 %v2450_v0 }
  0xf0   :  { %2169 = vmatpush3.bf16.msra.mxu0 %v2579_v55  ;;  %v785_v55 = vand.u32 4294901760, %v737_v38 }
  0xf1   :  { %2170 = vmatprep.subr.bf16.mxu0 %v2450_v0 }
  0xf2   :  { %v2792_v60 = vpack.c.bf16 %v788_v59, %v785_v55  ;;  %v907_v59 = vand.u32 4294901760, %v906_v58 }
  0xf4   :  { %2172 = vmatpush3.bf16.msra.mxu0 %v2591_v62  ;;  %v740_v62 = vld [vmem:[#allocation7 + $0x78] sm:$0xff]  ;;  %2196 = vmatpush3.bf16.msra.mxu1 %v2792_v60 }
  0xf5   :  { %2173 = vmatprep.subr.bf16.mxu0 %v2450_v0  ;;  %2197 = vmatprep.subr.bf16.mxu1 %v2450_v0  ;;  %v794_v28 = vand.u32 4294901760, %v740_v62 }
  0xf7   :  { %v2806_v34 = vpack.c.bf16 %v794_v28, %v791_v4  ;;  %v2810_v36 = vsub.f32 %v740_v62, %v794_v28  ;;  %v913_v28 = vsub.f32 %v2794_v63, %v912_v61 }
  0xf8   :  { %2175 = vmatpush3.bf16.msra.mxu0 %v2595_v2  ;;  %v2799_v2 = vsub.f32 %v737_v38, %v785_v55 }
  0xf9   :  { %2199 = vmatpush3.bf16.msra.mxu1 %v2806_v34  ;;  %v914_v39 = vand.u32 4294901760, %v913_v28  ;;  %v3022_v6 = vand.u32 4294901760, %v2810_v36  ;;  %v2231_v28 = vpack.c.bf16 %v2688_v20, %v2685_v19  ;;  %v2246_v41 = vpack.c.bf16 %v2810_v36, %v2808_v35 }
  0xfa   :  { %2200 = vmatprep.subr.bf16.mxu1 %v2450_v0  ;;  %v926_v30 = vand.u32 4294901760, %v2799_v2  ;;  %v3025_v19 = vand.u32 4294901760, %v2801_v3 }
  0xfb   :  { %1820 = vmatmul.mubr.f32.vlgmr.msra.gmra.mrb[0].mxu0 %v2550_v31  ;;  %v2796_v31 = vsub.f32 %v736_v13, %v782_v26  ;;  %v898_v13 = vand.u32 4294901760, %v2696_v14  ;;  %v2210_v26 = vpack.c.bf16 %v893_v12, %v886_v54  ;;  %v948_v54 = vsub.f32 %v2810_v36, %v3022_v6 }
  0xfc   :  { %v927_v15 = vsub.f32 %v2799_v2, %v926_v30  ;;  %v942_v12 = vand.u32 4294901760, %v941_v52  ;;  %v2291_v20 = vpack.c.bf16 %v3025_v19, %v926_v30 }
  0xfd   :  { %v899_v38 = vsub.f32 %v2696_v14, %v898_v13  ;;  %v919_v62 = vand.u32 4294901760, %v2796_v31 }
  0xfe   :  { %v928_v49 = vand.u32 4294901760, %v927_v15  ;;  %v2243_v15 = vpack.c.bf16 %v2801_v3, %v2799_v2 }
  0xff   :  { %v900_v55 = vand.u32 4294901760, %v899_v38  ;;  %v920_v37 = vsub.f32 %v2796_v31, %v919_v62  ;;  %v949_v38 = vand.u32 4294901760, %v948_v54 }
 0x100   :  { %v2219_v50 = vpack.c.bf16 %v935_v21, %v928_v49  ;;  %v1406_v49 = vld [vmem:[%s3018_s2] ss:$0 sm:$0xff] }
 0x101   :  { %v2213_v4 = vpack.c.bf16 %v907_v59, %v900_v55  ;;  %v921_v9 = vand.u32 4294901760, %v920_v37  ;;  %v2222_v58 = vpack.c.bf16 %v949_v38, %v942_v12  ;;  %v2225_v55 = vpack.c.bf16 %v2675_v42, %v2673_v33 }
 0x102   :  { %v2228_v59 = vpack.c.bf16 %v2683_v56, %v2677_v48  ;;  %v2234_v37 = vpack.c.bf16 %v2694_v44, %v2692_v43  ;;  %v2279_v33 = vpack.c.bf16 %v877_v46, %v870_v16  ;;  %v2282_v42 = vpack.c.bf16 %v891_v27, %v884_v22 }
 0x103   :  { %v2216_v25 = vpack.c.bf16 %v921_v9, %v914_v39  ;;  %v2237_v39 = vpack.c.bf16 %v2698_v23, %v2696_v14  ;;  %v2240_v9 = vpack.c.bf16 %v2796_v31, %v2794_v63  ;;  %v2285_v48 = vpack.c.bf16 %v905_v18, %v898_v13 }
 0x104   :  { %v2288_v56 = vpack.c.bf16 %v919_v62, %v912_v61  ;;  %v3026_v43 = vand.u32 4294901760, %v2808_v35  ;;  %v3027_v44 = vand.u32 4294901760, %v2810_v36 }
 0x106   :  { %v2294_v14 = vpack.c.bf16 %v3027_v44, %v3026_v43 }
 0x1ce   :  { %v721_v21 = vpop.f32.mrb[0].mxu0 }
 0x1cf   :  { %v2320_v52 = vadd.f32 %v1406_v49, %v721_v21  ;;  %v1821_v54 = vpop.f32.mrb[1].mxu0 }
 0x1d1   :  { %v2897_v12 = vand.u32 4294901760, %v2320_v52 }
 0x1d3   :  { %v830_v38 = vsub.f32 %v2320_v52, %v2897_v12 }
 0x1d5   :  { %v831_v6 = vand.u32 4294901760, %v830_v38 }
 0x1d7   :  { %v832_v57 = vsub.f32 %v830_v38, %v831_v6 }
 0x1d9   :  { %v833_v24 = vand.u32 4294901760, %v832_v57 }
 0x1db   :  { %1855 = vmatmul.mubr.f32.vlgmr.msra.gmra.mrb[0].mxu1 %v833_v24 }
 0x1dc   :  { %2202 = vmatpush3.bf16.msra.mxu1 %v2828_v40  ;;  %1889 = vmatprep.mubr.msk.f32.mxu1 %vm2451_vm0, %v2452_v1  ;;  %v2273_v40 = vpack.c.bf16 %v849_v32, %v842_v29 }
 0x1dd   :  { %2203 = vmatprep.subr.bf16.mxu1 %v2450_v0 }
 0x1e0   :  { %2205 = vmatpush3.bf16.msra.mxu1 %v2204_v17  ;;  %v2276_v17 = vpack.c.bf16 %v863_v11, %v856_v10 }
 0x1e1   :  { %2206 = vmatprep.subr.bf16.mxu1 %v2450_v0 }
 0x1e4   :  { %2208 = vmatpush3.bf16.msra.mxu1 %v2207_v7 }
 0x1e5   :  { %2209 = vmatprep.subr.bf16.mxu1 %v2450_v0 }
 0x1e8   :  { %2211 = vmatpush3.bf16.msra.mxu1 %v2210_v26 }
 0x1e9   :  { %2212 = vmatprep.subr.bf16.mxu1 %v2450_v0 }
 0x1ec   :  { %2214 = vmatpush3.bf16.msra.mxu1 %v2213_v4 }
 0x1ed   :  { %2215 = vmatprep.subr.bf16.mxu1 %v2450_v0 }
 0x1f0   :  { %2217 = vmatpush3.bf16.msra.mxu1 %v2216_v25 }
 0x1f1   :  { %2218 = vmatprep.subr.bf16.mxu1 %v2450_v0 }
 0x1f4   :  { %2220 = vmatpush3.bf16.msra.mxu1 %v2219_v50 }
 0x1f5   :  { %2221 = vmatprep.subr.bf16.mxu1 %v2450_v0 }
 0x1f8   :  { %2223 = vmatpush3.bf16.msra.mxu1 %v2222_v58 }
 0x1f9   :  { %2224 = vmatprep.subr.bf16.mxu1 %v2450_v0 }
 0x1fb   :  { %1890 = vmatmul.mubr.f32.vlgmr.msra.gmra.mrb[0].mxu1 %v2897_v12 }
 0x1fc   :  { %2226 = vmatpush3.bf16.msra.mxu1 %v2225_v55  ;;  %1924 = vmatprep.mubr.msk.f32.mxu1 %vm2451_vm0, %v2452_v1 }
 0x1fd   :  { %2227 = vmatprep.subr.bf16.mxu1 %v2450_v0 }
 0x200   :  { %2229 = vmatpush3.bf16.msra.mxu1 %v2228_v59 }
 0x201   :  { %2230 = vmatprep.subr.bf16.mxu1 %v2450_v0 }
 0x204   :  { %2232 = vmatpush3.bf16.msra.mxu1 %v2231_v28 }
 0x205   :  { %2233 = vmatprep.subr.bf16.mxu1 %v2450_v0 }
 0x208   :  { %2235 = vmatpush3.bf16.msra.mxu1 %v2234_v37 }
 0x209   :  { %2236 = vmatprep.subr.bf16.mxu1 %v2450_v0 }
 0x20c   :  { %2238 = vmatpush3.bf16.msra.mxu1 %v2237_v39 }
 0x20d   :  { %2239 = vmatprep.subr.bf16.mxu1 %v2450_v0 }
 0x210   :  { %2241 = vmatpush3.bf16.msra.mxu1 %v2240_v9 }
 0x211   :  { %2242 = vmatprep.subr.bf16.mxu1 %v2450_v0 }
 0x214   :  { %2244 = vmatpush3.bf16.msra.mxu1 %v2243_v15 }
 0x215   :  { %2245 = vmatprep.subr.bf16.mxu1 %v2450_v0 }
 0x218   :  { %2247 = vmatpush3.bf16.msra.mxu1 %v2246_v41 }
 0x219   :  { %2248 = vmatprep.subr.bf16.mxu1 %v2450_v0 }
 0x21b   :  { %1925 = vmatmul.mubr.f32.vlgmr.msra.gmra.mrb[0].mxu1 %v830_v38 }
 0x21c   :  { %2250 = vmatpush3.bf16.msra.mxu1 %v2671_v47  ;;  %1959 = vmatprep.mubr.msk.f32.mxu1 %vm2451_vm0, %v2452_v1 }
 0x21d   :  { %2251 = vmatprep.subr.bf16.mxu1 %v2450_v0 }
 0x220   :  { %2253 = vmatpush3.bf16.msra.mxu1 %v2681_v53 }
 0x221   :  { %2254 = vmatprep.subr.bf16.mxu1 %v2450_v0 }
 0x224   :  { %2256 = vmatpush3.bf16.msra.mxu1 %v2703_v5 }
 0x225   :  { %2257 = vmatprep.subr.bf16.mxu1 %v2450_v0 }
 0x228   :  { %2259 = vmatpush3.bf16.msra.mxu1 %v2710_v8 }
 0x229   :  { %2260 = vmatprep.subr.bf16.mxu1 %v2450_v0 }
 0x22c   :  { %2262 = vmatpush3.bf16.msra.mxu1 %v2717_v51 }
 0x22d   :  { %2263 = vmatprep.subr.bf16.mxu1 %v2450_v0 }
 0x230   :  { %2265 = vmatpush3.bf16.msra.mxu1 %v2788_v45 }
 0x231   :  { %2266 = vmatprep.subr.bf16.mxu1 %v2450_v0 }
 0x234   :  { %2268 = vmatpush3.bf16.msra.mxu1 %v2792_v60 }
 0x235   :  { %2269 = vmatprep.subr.bf16.mxu1 %v2450_v0 }
 0x238   :  { %2271 = vmatpush3.bf16.msra.mxu1 %v2806_v34 }
 0x239   :  { %2272 = vmatprep.subr.bf16.mxu1 %v2450_v0 }
 0x23b   :  { %1960 = vmatmul.mubr.f32.vlgmr.msra.gmra.mrb[0].mxu1 %v831_v6 }
 0x23c   :  { %2274 = vmatpush3.bf16.msra.mxu1 %v2273_v40  ;;  %1994 = vmatprep.mubr.msk.f32.mxu1 %vm2451_vm0, %v2452_v1 }
 0x23d   :  { %2275 = vmatprep.subr.bf16.mxu1 %v2450_v0 }
 0x240   :  { %2277 = vmatpush3.bf16.msra.mxu1 %v2276_v17 }
 0x241   :  { %2278 = vmatprep.subr.bf16.mxu1 %v2450_v0 }
 0x244   :  { %2280 = vmatpush3.bf16.msra.mxu1 %v2279_v33 }
 0x245   :  { %2281 = vmatprep.subr.bf16.mxu1 %v2450_v0 }
 0x248   :  { %2283 = vmatpush3.bf16.msra.mxu1 %v2282_v42 }
 0x249   :  { %2284 = vmatprep.subr.bf16.mxu1 %v2450_v0 }
 0x24c   :  { %2286 = vmatpush3.bf16.msra.mxu1 %v2285_v48 }
 0x24d   :  { %2287 = vmatprep.subr.bf16.mxu1 %v2450_v0 }
 0x250   :  { %2289 = vmatpush3.bf16.msra.mxu1 %v2288_v56 }
 0x251   :  { %2290 = vmatprep.subr.bf16.mxu1 %v2450_v0 }
 0x254   :  { %2292 = vmatpush3.bf16.msra.mxu1 %v2291_v20 }
 0x255   :  { %2293 = vmatprep.subr.bf16.mxu1 %v2450_v0 }
 0x258   :  { %2295 = vmatpush3.bf16.msra.mxu1 %v2294_v14 }
 0x259   :  { %2296 = vmatprep.subr.bf16.mxu1 %v2450_v0 }
 0x25b   :  { %1995 = vmatmul.mubr.f32.vlgmr.msra.gmra.mrb[0].mxu1 %v2897_v12 }
 0x25c   :  { %2298 = vmatpush3.bf16.msra.mxu1 %v2671_v47  ;;  %2029 = vmatprep.mubr.msk.f32.mxu1 %vm2451_vm0, %v2452_v1  ;;  %v1407_v1 = vld [vmem:[%s3020_s4] ss:$0 sm:$0xff] }
 0x25d   :  { %2299 = vmatprep.subr.bf16.mxu1 %v2450_v0 }
 0x260   :  { %2301 = vmatpush3.bf16.msra.mxu1 %v2681_v53 }
 0x261   :  { %2302 = vmatprep.subr.bf16.mxu1 %v2450_v0 }
 0x264   :  { %2304 = vmatpush3.bf16.msra.mxu1 %v2703_v5 }
 0x265   :  { %2305 = vmatprep.subr.bf16.mxu1 %v2450_v0 }
 0x268   :  { %2307 = vmatpush3.bf16.msra.mxu1 %v2710_v8 }
 0x269   :  { %2308 = vmatprep.subr.bf16.mxu1 %v2450_v0 }
 0x26c   :  { %2310 = vmatpush3.bf16.msra.mxu1 %v2717_v51 }
 0x26d   :  { %2311 = vmatprep.subr.bf16.mxu1 %v2450_v0 }
 0x270   :  { %2313 = vmatpush3.bf16.msra.mxu1 %v2788_v45 }
 0x271   :  { %2314 = vmatprep.subr.bf16.mxu1 %v2450_v0 }
 0x274   :  { %2316 = vmatpush3.bf16.msra.mxu1 %v2792_v60 }
 0x275   :  { %2317 = vmatprep.subr.bf16.mxu1 %v2450_v0 }
 0x278   :  { %2319 = vmatpush3.bf16.msra.mxu1 %v2806_v34 }
 0x27b   :  { %2030 = vmatmul.mubr.f32.vlgmr.msra.gmra.mrb[0].mxu1 %v2897_v12 }
 0x34e   :  { %v1385_v47 = vpop.f32.mrb[0].mxu1 }
 0x34f   :  { %v2321_v53 = vadd.f32 %v1407_v1, %v1385_v47  ;;  %v2031_v23 = vpop.f32.mrb[1].mxu1 }
 0x351   :  { %1389 = vst [vmem:[#allocation8] sm:$0xff] %v2321_v53 }
 0x352   :  { %2428 = shalt.err (!%p2425_p0)
}
 0x353   :  { %s2429_s11 = scalar_lea.hbm %s3021_s5, 128 }
 0x354   :  { %p2430_p1 = scmp.ne.s32.totalorder %s3021_s5, %s2429_s11  ;;  %p2433_p2 = scmp.lt.u32.totalorder %s2429_s11, %s3021_s5 }
 0x356   :  { %p2435_p3 = pnand %p2433_p2, %p2430_p1 }
 0x358   :  { %2438 = shalt.err (!%p2435_p3)
}
 0x359   :  { %1399 = dma.vmem_to_hbm [thread:$0]  %s1397_s7, 128, %s3021_s5, [#allocation4]  }
 0x35a   :  { %2443 = dma.done.wait [#allocation4], 128  }
 0x35b   :  { %2444 = vsyncadd [#allocation4], 4294967168 }
 0x35c   :  { %1403 = vsyncpa [#allocation3], 1 }
 0x35d   :  { %1404 = vsyncpa [#allocation6], 1 }
 0x35e   :  { %1405 = vsyncpa [#allocation4], 1 }

</bundles_post_ra>
